<compile_context>
chip_gen: v5e
topology: v5e:2x2
jax: 0.10.0
libtpu: 0.0.40
codegen_flags: <defaults>
</compile_context>

<pallas_src>
import functools

import jax
import jax.numpy as jnp
from jax import lax
from jax.experimental import pallas as pl
from jax.experimental.pallas import tpu as pltpu


def _cdiv(a, b):
    return -(-a // b)


def _iw_maxsquare_stats_kernel(x_ref, out_ref, *, tp, tiles_per_shard, n_valid,
                               ignore_index):
    """Grid = (image, spatial_shard, tile_in_shard).

    x_ref:   (1, C, tp) prob tile in its native dtype.
    out_ref: (1, 1, C, 2) f32 per-(image, shard) stats:
             [..., 0] = per-class valid-pixel count (hist)
             [..., 1] = per-class sum over matching valid pixels of sum_c prob^2
    """
    s = pl.program_id(1)
    j = pl.program_id(2)

    @pl.when(j == 0)
    def _init():
        out_ref[...] = jnp.zeros_like(out_ref)

    x = x_ref[0]                                                 # (C, tp) native dtype
    C = x.shape[0]

    # Lanes past the true spatial extent (ragged last tile / dummy clamped shard tiles).
    base = (s * tiles_per_shard + j) * tp
    lane = lax.broadcasted_iota(jnp.int32, (1, tp), 1)
    in_range = (base + lane) < n_valid                           # (1, tp)

    # First-occurrence argmax over channels in the native dtype (compares are exact;
    # matches torch.max / jnp.argmax tie-breaking).
    xm = jnp.max(x, axis=0, keepdims=True)                       # (1, tp)
    cidx = lax.broadcasted_iota(jnp.int32, (C, tp), 0)           # (C, tp)
    arg = jnp.min(jnp.where(x == xm, cidx, C), axis=0, keepdims=True)
    # Ignored pixels (maxpred == ignore_index, exact float match like the reference —
    # only sensible for ignore_index < 0) and out-of-range lanes map to sentinel class C
    # so they drop out of both hist and S (also neutralizes any garbage in ragged tiles).
    invalid = jnp.logical_or(xm == jnp.asarray(ignore_index, x.dtype),
                             jnp.logical_not(in_range))
    arg = jnp.where(invalid, C, arg)                             # (1, tp)
    m = cidx == arg                                              # (C, tp) one-hot mask

    xf = x.astype(jnp.float32)
    psq = jnp.sum(xf * xf, axis=0, keepdims=True)                # (1, tp) f32

    hist_part = jnp.sum(jnp.where(m, 1.0, 0.0), axis=1, keepdims=True)   # (C, 1)
    s_part = jnp.sum(jnp.where(m, psq, 0.0), axis=1, keepdims=True)      # (C, 1)

    out_ref[0, 0, :, 0:1] += hist_part
    out_ref[0, 0, :, 1:2] += s_part


def iw_max_square_loss(pred, prob, label=None, *, ignore_index=-1, num_class=19,
                       ratio=0.2, max_tile=None, spatial_shards=2):
    """prob: (N, C, H, W). `pred` is accepted for interface parity but (as in the
    PyTorch forward) does not affect the loss value."""
    if label is not None:
        # TODO(synk): support an explicit `label` map for the class histogram.
        raise NotImplementedError("label != None path is not implemented")

    N, C, H, W = prob.shape
    assert C == num_class, "kernel assumes prob.shape[1] == num_class"
    P = H * W
    itemsize = jnp.dtype(prob.dtype).itemsize

    x = prob.reshape(N, C, P)                      # keep native dtype (no f32 upcast)

    # ---- VMEM-aware spatial tile sizing --------------------------------------------
    try:
        vmem_bytes = int(pltpu.get_tpu_info().vmem_capacity_bytes)
    except Exception:
        vmem_bytes = 64 * 1024 * 1024              # conservative: v7x per-TC VMEM
    budget = min(vmem_bytes // 4, 24 * 1024 * 1024)
    # Per-lane VMEM estimate: double-buffered native input + a few f32/int32 (C, tp)
    # temporaries the compiler materializes, plus (1, tp) rows.
    per_lane_bytes = C * (2 * itemsize + 16) + 32
    tp_cap = budget // per_lane_bytes
    tp_cap = max(128, min(65536, (tp_cap // 128) * 128))
    if max_tile is not None:
        tp_cap = min(tp_cap, max(128, (int(max_tile) // 128) * 128))

    if P <= tp_cap:
        tp, n_ptiles = P, 1                        # full-extent block (any P is legal)
    else:
        tp, n_ptiles = tp_cap, _cdiv(P, tp_cap)    # multiple-of-128 tile, ragged tail
                                                   # masked in-kernel (no jnp.pad pass)

    n_shards = max(1, min(int(spatial_shards), n_ptiles))
    tiles_per_shard = _cdiv(n_ptiles, n_shards)

    kernel = functools.partial(
        _iw_maxsquare_stats_kernel, tp=tp, tiles_per_shard=tiles_per_shard,
        n_valid=P, ignore_index=float(ignore_index))

    def x_index_map(i, s, j, _tps=tiles_per_shard, _last=n_ptiles - 1):
        # Dummy tiles of the last shard clamp to a real block; the kernel's in_range
        # mask zeroes their contribution.
        return (i, 0, jnp.minimum(s * _tps + j, _last))

    need = per_lane_bytes * tp + (8 << 20)
    vmem_limit = int(min(max(need, 48 << 20), (vmem_bytes * 3) // 4))

    cost = pl.CostEstimate(
        flops=int(10 * N * C * P),
        transcendentals=0,
        bytes_accessed=int(N * C * P * itemsize + N * n_shards * C * 2 * 4))

    stats = pl.pallas_call(
        kernel,
        out_shape=jax.ShapeDtypeStruct((N, n_shards, C, 2), jnp.float32),
        grid_spec=pltpu.PrefetchScalarGridSpec(
            num_scalar_prefetch=0,
            grid=(N, n_shards, tiles_per_shard),
            in_specs=[pl.BlockSpec((1, C, tp), x_index_map)],
            out_specs=pl.BlockSpec((1, 1, C, 2), lambda i, s, j: (i, s, 0, 0)),
        ),
        compiler_params=pltpu.CompilerParams(
            dimension_semantics=("parallel", "parallel", "arbitrary"),
            vmem_limit_bytes=vmem_limit),
        cost_estimate=cost,
    )(x)

    # ---- O(N*C) image-wise weighting in the wrapper ---------------------------------
    stats = jnp.sum(stats, axis=1)                 # (N, C, 2): reduce spatial shards
    hist = stats[..., 0]                           # (N, C) valid-pixel counts (exact <2^24)
    s_sq = stats[..., 1]                           # (N, C) weighted-square partials
    total = jnp.sum(hist, axis=1, keepdims=True)   # (N, 1)
    wpc = 1.0 / jnp.maximum(
        jnp.power(hist, ratio) * jnp.power(total, 1.0 - ratio), 1.0)
    return -jnp.sum(wpc * s_sq) / (N * num_class)


def _reference_loss(prob, *, ignore_index=-1, num_class=19, ratio=0.2):
    """Pure-JAX re-implementation of the PyTorch forward (label=None) for checking."""
    p = prob.astype(jnp.float32)
    N = p.shape[0]
    maxpred = jnp.max(p, axis=1)                   # (N, H, W)
    argpred = jnp.argmax(p, axis=1)                # (N, H, W)
    valid = maxpred != ignore_index
    argpred = jnp.where(valid, argpred, -1)

    def per_image(ap):
        hist = jnp.stack([jnp.sum((ap == c).astype(jnp.float32))
                          for c in range(num_class)])
        wpc = 1.0 / jnp.maximum(hist ** ratio * hist.sum() ** (1.0 - ratio), 1.0)
        return wpc[jnp.clip(ap, 0, num_class - 1)]   # invalid pixels masked below

    weights = jnp.stack([per_image(argpred[i]) for i in range(N)], axis=0)
    sq = jnp.sum(p * p, axis=1)                    # (N, H, W)
    return -jnp.sum(jnp.where(valid, weights * sq, 0.0)) / (N * num_class)


if __name__ == "__main__":
    key = jax.random.PRNGKey(0)
    N, C, H, W = 2, 4, 16, 16
    k1, k2, k3, k4 = jax.random.split(key, 4)

    pred = jax.random.normal(k1, (N, C, H, W), dtype=jnp.float32)   # unused by the loss
    prob = jax.nn.softmax(jax.random.normal(k2, (N, C, H, W), dtype=jnp.float32), axis=1)
    prob = prob.at[:, :, 0, 0].set(-1.0)     # ignore_index pixels (maxpred == -1)

    # f32 inputs, single-tile path
    loss = iw_max_square_loss(pred, prob, ignore_index=-1, num_class=C, ratio=0.2)
    loss = jax.block_until_ready(loss)
    ref = _reference_loss(prob, ignore_index=-1, num_class=C, ratio=0.2)
    assert jnp.allclose(loss, ref, rtol=1e-5, atol=1e-6), (loss, ref)

    # bf16 inputs: native-dtype argmax chain, f32 only for the squared accumulation
    prob_bf16 = prob.astype(jnp.bfloat16)
    loss_bf = iw_max_square_loss(pred, prob_bf16, ignore_index=-1, num_class=C, ratio=0.2)
    loss_bf = jax.block_until_ready(loss_bf)
    ref_bf = _reference_loss(prob_bf16, ignore_index=-1, num_class=C, ratio=0.2)
    assert jnp.allclose(loss_bf, ref_bf, rtol=1e-5, atol=1e-6), (loss_bf, ref_bf)

    # multi-tile + multi-shard accumulation path (force tiny tiles)
    loss_mt = iw_max_square_loss(pred, prob, ignore_index=-1, num_class=C, ratio=0.2,
                                 max_tile=128, spatial_shards=2)
    loss_mt = jax.block_until_ready(loss_mt)
    assert jnp.allclose(loss_mt, ref, rtol=1e-5, atol=1e-6), (loss_mt, ref)

    # non-128-multiple spatial extent, single full-extent tile (no padding anywhere)
    H2, W2 = 10, 12
    prob2 = jax.nn.softmax(jax.random.normal(k3, (N, C, H2, W2), dtype=jnp.float32), axis=1)
    loss2 = iw_max_square_loss(None, prob2, ignore_index=-1, num_class=C, ratio=0.2)
    loss2 = jax.block_until_ready(loss2)
    ref2 = _reference_loss(prob2, ignore_index=-1, num_class=C, ratio=0.2)
    assert jnp.allclose(loss2, ref2, rtol=1e-5, atol=1e-6), (loss2, ref2)

    # ragged multi-tile + uneven shard split (P=520 -> 5 tiles of 128, 2 shards of 3,
    # with one clamped dummy tile and an in-kernel-masked ragged tail)
    H3, W3 = 13, 40
    prob3 = jax.nn.softmax(jax.random.normal(k4, (N, C, H3, W3), dtype=jnp.float32), axis=1)
    prob3 = prob3.at[:, :, 0, 0].set(-1.0)
    loss3 = iw_max_square_loss(None, prob3, ignore_index=-1, num_class=C, ratio=0.2,
                               max_tile=128, spatial_shards=2)
    loss3 = jax.block_until_ready(loss3)
    ref3 = _reference_loss(prob3, ignore_index=-1, num_class=C, ratio=0.2)
    assert jnp.allclose(loss3, ref3, rtol=1e-5, atol=1e-6), (loss3, ref3)

    print("KERNEL_OK")
</pallas_src>

<mosaic_0001>
module attributes {stable_mosaic.version = 11 : i64} {
  func.func @_iw_maxsquare_stats_kernel(%arg0: i32, %arg1: i32, %arg2: i32, %arg3: memref<1x4x256xf32, #tpu.memory_space<vmem>>, %arg4: memref<1x1x4x2xf32, #tpu.memory_space<vmem>>) attributes {dimension_semantics = [#tpu.dimension_semantics<parallel>, #tpu.dimension_semantics<parallel>, #tpu.dimension_semantics<arbitrary>], iteration_bounds = array<i64: 2, 1, 1>, scalar_prefetch = 0 : i64, scratch_operands = 0 : i64, tpu.core_type = #tpu.core_type<tc>, window_params = [{transform_indices = @transform_0, window_bounds = array<i64: 1, 4, 256>}, {transform_indices = @transform_1, window_bounds = array<i64: 1, 1, 4, 2>}]} {
    %c0_i32 = arith.constant 0 : i32
    %0 = arith.cmpi eq, %arg2, %c0_i32 : i32
    %1 = arith.extui %0 : i1 to i32
    %c0_i32_0 = arith.constant 0 : i32
    %2 = arith.cmpi ne, %1, %c0_i32_0 : i32
    scf.if %2 {
      %cst_29 = arith.constant 0.000000e+00 : f32
      %56 = vector.broadcast %cst_29 : f32 to vector<1x1x4x2xf32>
      %c0_30 = arith.constant 0 : index
      %c0_31 = arith.constant 0 : index
      %c0_32 = arith.constant 0 : index
      %c0_33 = arith.constant 0 : index
      %57 = vector.load %arg4[%c0_30, %c0_31, %c0_32, %c0_33] : memref<1x1x4x2xf32, #tpu.memory_space<vmem>>, vector<1x1x4x2xf32>
      tpu.vector_store %arg4[%c0_30, %c0_31, %c0_32, %c0_33], %56 {strides = array<i32>} : memref<1x1x4x2xf32, #tpu.memory_space<vmem>>, vector<1x1x4x2xf32>,
    } else {
    }
    %c0 = arith.constant 0 : index
    %c0_1 = arith.constant 0 : index
    %c0_2 = arith.constant 0 : index
    %3 = vector.load %arg3[%c0, %c0_1, %c0_2] : memref<1x4x256xf32, #tpu.memory_space<vmem>>, vector<1x4x256xf32>
    %4 = vector.shape_cast %3 : vector<1x4x256xf32> to vector<4x256xf32>
    %c1_i32 = arith.constant 1 : i32
    %5 = arith.muli %arg1, %c1_i32 : i32
    %6 = arith.addi %5, %arg2 : i32
    %c256_i32 = arith.constant 256 : i32
    %7 = arith.muli %6, %c256_i32 : i32
    %8 = tpu.iota {dimensions = array<i32: 1>} : vector<1x256xi32>
    %9 = vector.broadcast %7 : i32 to vector<1x256xi32>
    %10 = arith.addi %9, %8 : vector<1x256xi32>
    %c256_i32_3 = arith.constant 256 : i32
    %11 = vector.broadcast %c256_i32_3 : i32 to vector<1x256xi32>
    %12 = arith.cmpi slt, %10, %11 : vector<1x256xi32>
    %cst = arith.constant dense<0xFF800000> : vector<256xf32>
    %13 = vector.multi_reduction <maximumf>, %4, %cst [0] : vector<4x256xf32> to vector<256xf32>
    %14 = vector.shape_cast %13 : vector<256xf32> to vector<1x256xf32>
    %15 = tpu.iota {dimensions = array<i32: 0>} : vector<4x256xi32>
    %16 = vector.broadcast %14 : vector<1x256xf32> to vector<4x256xf32>
    %17 = arith.cmpf oeq, %4, %16 : vector<4x256xf32>
    %c4_i32 = arith.constant 4 : i32
    %18 = vector.broadcast %c4_i32 : i32 to vector<4x256xi32>
    %19 = arith.select %17, %15, %18 : vector<4x256xi1>, vector<4x256xi32>
    %cst_4 = arith.constant dense<2147483647> : vector<256xi32>
    %20 = vector.multi_reduction <minsi>, %19, %cst_4 [0] : vector<4x256xi32> to vector<256xi32>
    %21 = vector.shape_cast %20 : vector<256xi32> to vector<1x256xi32>
    %cst_5 = arith.constant -1.000000e+00 : f32
    %22 = vector.broadcast %cst_5 : f32 to vector<1x256xf32>
    %23 = arith.cmpf oeq, %14, %22 : vector<1x256xf32>
    %cst_6 = arith.constant dense<true> : vector<1x256xi1>
    %24 = arith.xori %12, %cst_6 : vector<1x256xi1>
    %25 = arith.ori %23, %24 : vector<1x256xi1>
    %c4_i32_7 = arith.constant 4 : i32
    %26 = vector.broadcast %c4_i32_7 : i32 to vector<1x256xi32>
    %27 = arith.select %25, %26, %21 : vector<1x256xi1>, vector<1x256xi32>
    %28 = vector.broadcast %27 : vector<1x256xi32> to vector<4x256xi32>
    %29 = arith.cmpi eq, %15, %28 : vector<4x256xi32>
    %30 = arith.mulf %4, %4 : vector<4x256xf32>
    %cst_8 = arith.constant dense<0.000000e+00> : vector<256xf32>
    %31 = vector.multi_reduction <add>, %30, %cst_8 [0] : vector<4x256xf32> to vector<256xf32>
    %32 = vector.shape_cast %31 : vector<256xf32> to vector<1x256xf32>
    %cst_9 = arith.constant 1.000000e+00 : f32
    %cst_10 = arith.constant 0.000000e+00 : f32
    %33 = vector.broadcast %cst_9 : f32 to vector<4x256xf32>
    %34 = vector.broadcast %cst_10 : f32 to vector<4x256xf32>
    %35 = arith.select %29, %33, %34 : vector<4x256xi1>, vector<4x256xf32>
    %cst_11 = arith.constant dense<0.000000e+00> : vector<4xf32>
    %36 = vector.multi_reduction <add>, %35, %cst_11 [1] : vector<4x256xf32> to vector<4xf32>
    %37 = vector.shape_cast %36 : vector<4xf32> to vector<4x1xf32>
    %cst_12 = arith.constant 0.000000e+00 : f32
    %38 = vector.shape_cast %32 : vector<1x256xf32> to vector<1x256xf32>
    %39 = vector.broadcast %38 : vector<1x256xf32> to vector<4x256xf32>
    %40 = vector.broadcast %cst_12 : f32 to vector<4x256xf32>
    %41 = arith.select %29, %39, %40 : vector<4x256xi1>, vector<4x256xf32>
    %cst_13 = arith.constant dense<0.000000e+00> : vector<4xf32>
    %42 = vector.multi_reduction <add>, %41, %cst_13 [1] : vector<4x256xf32> to vector<4xf32>
    %43 = vector.shape_cast %42 : vector<4xf32> to vector<4x1xf32>
    %c0_14 = arith.constant 0 : index
    %c0_15 = arith.constant 0 : index
    %c0_16 = arith.constant 0 : index
    %c0_17 = arith.constant 0 : index
    %44 = vector.load %arg4[%c0_14, %c0_15, %c0_16, %c0_17] : memref<1x1x4x2xf32, #tpu.memory_space<vmem>>, vector<1x1x4x1xf32>
    %45 = vector.shape_cast %44 : vector<1x1x4x1xf32> to vector<4x1xf32>
    %46 = arith.addf %45, %37 : vector<4x1xf32>
    %c0_18 = arith.constant 0 : index
    %c0_19 = arith.constant 0 : index
    %c0_20 = arith.constant 0 : index
    %c0_21 = arith.constant 0 : index
    %47 = vector.load %arg4[%c0_18, %c0_19, %c0_20, %c0_21] : memref<1x1x4x2xf32, #tpu.memory_space<vmem>>, vector<1x1x4x1xf32>
    %48 = vector.shape_cast %47 : vector<1x1x4x1xf32> to vector<4x1xf32>
    %49 = vector.shape_cast %46 : vector<4x1xf32> to vector<1x1x4x1xf32>
    tpu.vector_store %arg4[%c0_18, %c0_19, %c0_20, %c0_21], %49 {strides = array<i32>} : memref<1x1x4x2xf32, #tpu.memory_space<vmem>>, vector<1x1x4x1xf32>,
    %c0_22 = arith.constant 0 : index
    %c0_23 = arith.constant 0 : index
    %c0_24 = arith.constant 0 : index
    %c1 = arith.constant 1 : index
    %50 = vector.load %arg4[%c0_22, %c0_23, %c0_24, %c1] : memref<1x1x4x2xf32, #tpu.memory_space<vmem>>, vector<1x1x4x1xf32>
    %51 = vector.shape_cast %50 : vector<1x1x4x1xf32> to vector<4x1xf32>
    %52 = arith.addf %51, %43 : vector<4x1xf32>
    %c0_25 = arith.constant 0 : index
    %c0_26 = arith.constant 0 : index
    %c0_27 = arith.constant 0 : index
    %c1_28 = arith.constant 1 : index
    %53 = vector.load %arg4[%c0_25, %c0_26, %c0_27, %c1_28] : memref<1x1x4x2xf32, #tpu.memory_space<vmem>>, vector<1x1x4x1xf32>
    %54 = vector.shape_cast %53 : vector<1x1x4x1xf32> to vector<4x1xf32>
    %55 = vector.shape_cast %52 : vector<4x1xf32> to vector<1x1x4x1xf32>
    tpu.vector_store %arg4[%c0_25, %c0_26, %c0_27, %c1_28], %55 {strides = array<i32>} : memref<1x1x4x2xf32, #tpu.memory_space<vmem>>, vector<1x1x4x1xf32>,
    return
  }
  func.func @transform_0(%arg0: i32, %arg1: i32, %arg2: i32) -> (i32, i32, i32) {
    %c1_i32 = arith.constant 1 : i32
    %0 = arith.muli %arg1, %c1_i32 : i32
    %1 = arith.addi %0, %arg2 : i32
    %c0_i32 = arith.constant 0 : i32
    %2 = arith.minsi %1, %c0_i32 : i32
    %c0_i32_0 = arith.constant 0 : i32
    %c0_i32_1 = arith.constant 0 : i32
    return %arg0, %c0_i32_0, %2 : i32, i32, i32
  }
  func.func @transform_1(%arg0: i32, %arg1: i32, %arg2: i32) -> (i32, i32, i32, i32) {
    %c0_i32 = arith.constant 0 : i32
    %c0_i32_0 = arith.constant 0 : i32
    %c0_i32_1 = arith.constant 0 : i32
    return %arg0, %arg1, %c0_i32, %c0_i32_0 : i32, i32, i32, i32
  }
}

</mosaic_0001>

<bundles_post_ra>
// kernel: tpu_custom_call.1
= control target key start
LH: loop header
LB: loop body
LE: loop exit
PB: predicated region body
PF: predicated region fallthrough
CT: control target
= control target key end

     0   :  { %6 = vsyncpa [#allocation3], 0  ;;  %s670_s0 = inlined_call_operand.hbm [shape: f32[2,4,256], index: 0, kind: input, shape index: {}]   ;;  %s671_s1 = inlined_call_operand.vmem [shape: f32[2,1,4,2], index: 1, kind: output, shape index: {}]  }
   0x1   :  { %8 = vsyncpa [#allocation3 + $0x1], 0  ;;  %s559_s6 = smov 0   ;;  %s561_s7 = smov 0  }
   0x2   :  { %s563_s8 = smov 0   ;;  %s565_s9 = smov 0  }
   0x3   :  { %s567_s10 = smov 0   ;;  %s569_s11 = smov 0  }
   0x4 LB: > { %s395_s12 = sadd.s32 4294967295, %s545_s11   ;;  %s33_s13 = sadd.s32 1, %s541_s10  ;;  %s545_s11 = sphi %s569_s11, %s14_s11   ;;  %s541_s10 = sphi %s567_s10, %s678_s10   ;;  %s537_s9 = sphi %s565_s9, %s677_s9   ;;  %s533_s8 = sphi %s563_s8, %s676_s8   ;;  %s529_s7 = sphi %s561_s7, %s675_s7   ;;  %s525_s6 = sphi %s559_s6, %s674_s6  }
   0x5   : > { %p35_p0 = scmp.ge.s32.totalorder %s33_s13, 2  ;;  %s48_s14 = sadd.s32 1, %s533_s8 }
   0x6   : > { %p55_p1 = scmp.ne.s32.totalorder %s533_s8, %s529_s7  ;;  %p56_p2 = scmp.eq.s32.totalorder %s545_s11, 0 }
   0x7   : > { %s680_s13 = smov (%p35_p0, %s33_s13), 0  ;;  %p61_p4 = scmp.ne.s32.totalorder %s529_s7, %s525_s6 }
   0x8   : > { %p595_p3 = por %p56_p2, %p55_p1  ;;  %s43_s16 = ssub.s32 %s541_s10, %s680_s13 }
   0x9   : > { %p62_p5 = scmp.eq.s32.totalorder %s395_s12, 0  ;;  %p46_p6 = scmp.eq.s32.totalorder %s43_s16, 0 }
   0xa   : > { %p414_p8 = scmp.lt.s32.totalorder %s545_s11, 2  ;;  %s113_s19 = sand.u32 1, %s533_s8  }
   0xb   : > { %p602_p7 = por %p62_p5, %p61_p4  ;;  %s407_s20 = sshll.u32 %s541_s10, 3 }
   0xc   : > { %s608_s18 = scalar_select %p46_p6, %s533_s8, %s48_s14  }
   0xd   : > { %s399_s21 = sshll.u32 %s113_s19, 3  ;;  %s127_s24 = scalar_lea.hbm %s670_s0, %s407_s20 }
   0xe   : > { %s129_s25 = sshll.u32 %s127_s24, 4  ;;  %s117_s26 = scalar_lea.vmem [#allocation2], %s399_s21  ;;  %s130_s25 = int_to_ptr.hbm [resolvable:$true] %s129_s25 }
   0xf   : > { %s131_s27 = sshll.u32 %s117_s26, 4  ;;  %p411_p9 = pnand %p414_p8, %p595_p3  ;;  %s132_s27 = int_to_ptr.vmem [resolvable:$true] %s131_s27 }
  0x10   : > { %p402_p10 = scmp.ge.s32.totalorder %s545_s11, 1  ;;  %p136_p11 = scmp.lt.s32.totalorder %s545_s11, 3 }
  0x11   : > { %s114_s28 = scalar_lea.sflag [#allocation3], %s113_s19 }
  0x12   : > { %413 = dma.hbm_to_vmem [thread:$0]  (!%p411_p9), %s130_s25, 128, %s132_s27, %s114_s28  }
  0x13   : > { %p137_p12 = pnand %p402_p10, %p136_p11 }
  0x14   : > { %s142_s29 = sand.u32 (!%p137_p12), 1, %s529_s7  }
  0x15   : > { %140 = sbr.rel (%p137_p12) target bundleno = 210 (0xd2), region = 24  ;;  %s403_s30 = sshll.u32 (!%p137_p12), %s142_s29, 3 }
  0x16   : > { %s143_s2 = scalar_lea.sflag (!%p137_p12), [#allocation3], %s142_s29  ;;  %s146_s3 = scalar_lea.vmem (!%p137_p12), [#allocation2], %s403_s30 }
  0x1a   : > { %520 = dma.done.wait (%p602_p7), %s143_s2, 128  }
  0x1b   : > { %522 = vsyncadd (%p602_p7), %s143_s2, 4294967168  ;;  %v185_v0 = vld [vmem:[%s146_s3] sm:$0xff]  ;;  %vm202_vm0 = vcmask 1043456   ;;  %v217_v11 = vlaneseq  ;;  %v547_v12 = vmov 839922192   ;;  %p172_p13 = scmp.lt.s32.totalorder %s537_s9, 1 }
  0x1c   : > { %197 = vst [vmem:[#allocation1] ss:$2 sm:$0xff] %v185_v0  ;;  %v226_v13 = vunpack.c.l.s4 %v547_v12  ;;  %vm183_vm2 = vcmask 11264   ;;  %v263_v26 = vmul.f32 %v185_v0, %v185_v0  ;;  %v548_v27 = vmov 0.0  }
  0x1d   : > { %v627_v18 = vshrl.u32 %v217_v11, 7  ;;  %s682_s9 = smov (!%p172_p13, %s537_s9), 1  ;;  %vm300_vm13 = vcmask 3072   ;;  %vm304_vm14 = vcmask 11272  }
  0x1e   : > { %v227_v19 = vunpack.c.0.s8 %v226_v13  ;;  %s404_s4 = sshll.u32 %s682_s9, 2 }
  0x1f   : > { %s635_s12 = scalar_lea.vmem %s671_s1, %s404_s4 }
  0x20   : > { %v228_v23 = vperm.slane %v627_v18, %v227_v19  ;;  %184 = vst.msk [vmem:[%s635_s12] sm:$0xf] %vm183_vm2, %v548_v27 }
  0x23   : > { %v198_v1 = vld.sshfl [vmem:[#allocation1] sm:$0xff pattern:$0x75316420]  ;;  %v199_v2 = vld.sshfl [vmem:[#allocation1 + $0x8] sm:$0xff pattern:$0x75316420] }
  0x24   : > { %v203_v3 = vsel %vm202_vm0, %v198_v1, -inf  ;;  %v210_v4 = vsel %vm202_vm0, %v199_v2, -inf }
  0x25   : > { %v204_v5 = vrot.slane %v203_v3, 4  ;;  %v211_v6 = vrot.slane %v210_v4, 4 }
  0x27   : > { %v205_v7 = vmax.f32 %v203_v3, %v204_v5  ;;  %v212_v8 = vmax.f32 %v210_v4, %v211_v6 }
  0x29   : > { %v206_v9 = vrot.slane %v205_v7, 2  ;;  %v213_v10 = vrot.slane %v212_v8, 2 }
  0x2b   : > { %v207_v14 = vmax.f32 %v205_v7, %v206_v9  ;;  %v214_v15 = vmax.f32 %v212_v8, %v213_v10  ;;  %v298_v8 = vld [vmem:[%s635_s12] sm:$0xf] }
  0x2d   : > { %v208_v16 = vrot.slane %v207_v14, 1  ;;  %v215_v17 = vrot.slane %v214_v15, 1 }
  0x2f   : > { %v209_v20 = vmax.f32 %v207_v14, %v208_v16  ;;  %v216_v21 = vmax.f32 %v214_v15, %v215_v17 }
  0x31   : > { %v221_v22 = vrot.slane %v216_v21, 4  ;;  %vm253_vm7 = vcmp.eq.f32.partialorder %v209_v20, -1.0  ;;  %vm254_vm8 = vcmp.eq.f32.partialorder %v216_v21, -1.0 }
  0x33   : > { %v222_v24 = vsel %vm202_vm0, %v209_v20, %v221_v22 }
  0x34   : > { %vm224_vm1 = vcmp.eq.f32.partialorder %v185_v0, %v222_v24 }
  0x35   : > { %v229_v25 = vsel %vm224_vm1, %v228_v23, 4 }
  0x36   : > { %230 = vst [vmem:[#allocation1] ss:$2 sm:$0xff] %v229_v25 }
  0x3d   : > { %v231_v28 = vld.sshfl [vmem:[#allocation1] sm:$0xff pattern:$0x75316420]  ;;  %v232_v29 = vld.sshfl [vmem:[#allocation1 + $0x8] sm:$0xff pattern:$0x75316420] }
  0x3e   : > { %v233_v30 = vsel %vm202_vm0, %v231_v28, 2147483647  ;;  %v243_v31 = vsel %vm202_vm0, %v232_v29, 2147483647  ;;  %265 = vst [vmem:[#allocation1] ss:$2 sm:$0xff] %v263_v26 }
  0x3f   : > { %v234_v32 = vrot.slane %v233_v30, 4  ;;  %v244_v33 = vrot.slane %v243_v31, 4 }
  0x41   : > { %vm235_vm3 = vcmp.lt.s32.totalorder %v233_v30, %v234_v32  ;;  %vm245_vm4 = vcmp.lt.s32.totalorder %v243_v31, %v244_v33 }
  0x42   : > { %v236_v34 = vsel %vm235_vm3, %v233_v30, %v234_v32  ;;  %v246_v35 = vsel %vm245_vm4, %v243_v31, %v244_v33 }
  0x43   : > { %v237_v36 = vrot.slane %v236_v34, 2  ;;  %v247_v37 = vrot.slane %v246_v35, 2 }
  0x45   : > { %vm238_vm5 = vcmp.lt.s32.totalorder %v236_v34, %v237_v36  ;;  %vm248_vm6 = vcmp.lt.s32.totalorder %v246_v35, %v247_v37  ;;  %v266_v38 = vld.sshfl [vmem:[#allocation1] sm:$0xff pattern:$0x75316420]  ;;  %v267_v39 = vld.sshfl [vmem:[#allocation1 + $0x8] sm:$0xff pattern:$0x75316420] }
  0x46   : > { %v239_v40 = vsel %vm238_vm5, %v236_v34, %v237_v36  ;;  %v249_v41 = vsel %vm248_vm6, %v246_v35, %v247_v37  ;;  %v270_v42 = vsel %vm202_vm0, %v266_v38, 0.0  ;;  %v277_v43 = vsel %vm202_vm0, %v267_v39, 0.0 }
  0x47   : > { %v240_v44 = vrot.slane %v239_v40, 1  ;;  %v250_v45 = vrot.slane %v249_v41, 1  ;;  %v271_v46 = vrot.slane %v270_v42, 4  ;;  %v278_v47 = vrot.slane %v277_v43, 4 }
  0x49   : > { %vm241_vm9 = vcmp.lt.s32.totalorder %v239_v40, %v240_v44  ;;  %vm251_vm10 = vcmp.lt.s32.totalorder %v249_v41, %v250_v45  ;;  %v272_v48 = vadd.f32 %v271_v46, %v270_v42  ;;  %v279_v49 = vadd.f32 %v278_v47, %v277_v43 }
  0x4a   : > { %v242_v50 = vsel %vm241_vm9, %v239_v40, %v240_v44  ;;  %v252_v51 = vsel %vm251_vm10, %v249_v41, %v250_v45 }
  0x4b   : > { %v259_v52 = vsel %vm253_vm7, 4, %v242_v50  ;;  %v260_v53 = vsel %vm254_vm8, 4, %v252_v51  ;;  %v273_v54 = vrot.slane %v272_v48, 2  ;;  %v280_v55 = vrot.slane %v279_v49, 2 }
  0x4c   : > { %vm261_vm11 = vcmp.eq.s32.totalorder %v627_v18, %v259_v52  ;;  %vm262_vm12 = vcmp.eq.s32.totalorder %v627_v18, %v260_v53 }
  0x4d   : > { %v284_v56 = vsel %vm261_vm11, 1.0, %v548_v27  ;;  %v285_v57 = vsel %vm262_vm12, 1.0, %v548_v27  ;;  %v274_v58 = vadd.f32 %v273_v54, %v272_v48  ;;  %v281_v59 = vadd.f32 %v280_v55, %v279_v49 }
  0x4e   : > { %v286_v60 = vsel %vm202_vm0, %v284_v56, 0.0  ;;  %v287_v61 = vsel %vm202_vm0, %v285_v57, 0.0 }
  0x4f   : > { %v288_v62 = vadd.f32 %v287_v61, %v286_v60  ;;  %v275_v63 = vrot.slane %v274_v58, 1  ;;  %v282_v0 = vrot.slane %v281_v59, 1 }
  0x51   : > { %289 = vadd.xlane.f32.xlu0 %v288_v62  ;;  %v276_v1 = vadd.f32 %v275_v63, %v274_v58  ;;  %v283_v2 = vadd.f32 %v282_v0, %v281_v59 }
  0x53   : > { %v291_v3 = vsel %vm261_vm11, %v276_v1, 0.0  ;;  %v292_v4 = vsel %vm262_vm12, %v283_v2, 0.0 }
  0x54   : > { %v293_v5 = vsel %vm202_vm0, %v291_v3, 0.0  ;;  %v294_v6 = vsel %vm202_vm0, %v292_v4, 0.0 }
  0x55   : > { %v295_v7 = vadd.f32 %v294_v6, %v293_v5 }
  0x59   : > { %296 = vadd.xlane.f32.xlu0 %v295_v7 }
  0xc4   : > { %v290_v9 = vpop.xlane.xlu0 %289 }
  0xc5   : > { %v299_v10 = vadd.f32 %v298_v8, %v290_v9 }
  0xc7   : > { %301 = vst.msk [vmem:[%s635_s12] sm:$0xf] %vm300_vm13, %v299_v10 }
  0xcc   : > { %v297_v11 = vpop.xlane.xlu0 %296 }
  0xce   : > { %v302_v12 = vld [vmem:[%s635_s12] sm:$0xf] }
  0xcf   : > { %v303_v13 = vadd.f32 %v302_v12, %v297_v11 }
  0xd1   : > { %305 = vst.msk [vmem:[%s635_s12] sm:$0xf] %vm304_vm14, %v303_v13 }
  0xd2 PF: > { %s14_s11 = sadd.s32 1, %s545_s11   ;;  %s674_s6 = smov %s529_s7 }
  0xd3   : > { %p11_p0 = scmp.ge.s32.totalorder %s14_s11, 4   ;;  %s675_s7 = smov %s533_s8 }
  0xd4   : > { %s676_s8 = smov %s608_s18  ;;  %s677_s9 = smov %s541_s10 }
  0xd5   : > { %s678_s10 = smov %s680_s13  ;;  %13 = sbr.rel (!%p11_p0) target bundleno = 4 (0x4), region = 68 }
  0xda   :  { %331 = vsyncpa [#allocation3], 1 }
  0xdb   :  { %333 = vsyncpa [#allocation3 + $0x1], 1 }

</bundles_post_ra>
